<compile_context>
chip_gen: v5e
topology: v5e:2x2
jax: 0.10.0
libtpu: 0.0.40
codegen_flags: <defaults>
</compile_context>

<pallas_src>
import functools

import jax
import jax.numpy as jnp
from jax.experimental import pallas as pl
from jax.experimental.pallas import tpu as pltpu


def _round_up(x, m):
    return ((x + m - 1) // m) * m


def _phys_bytes(rows, cols, itemsize):
    # Physical VMEM footprint of a 2-D f32/bf16 block under (8,128) tiling.
    return _round_up(rows, 8) * _round_up(cols, 128) * itemsize


def _cat_last_kernel(h_ref, w_ref, b_ref, o_ref, *, bf16_operands):
    # ReLU (VPU) -> matmul (MXU, f32 accumulation) -> bias broadcast -> store.
    # TODO(synk): train-mode Dropout (stochastic mask) not implemented; this
    # is the eval-mode identity path.
    h = jnp.maximum(h_ref[...], 0.0)
    w = w_ref[...]
    if bf16_operands:
        h = h.astype(jnp.bfloat16)
        w = w.astype(jnp.bfloat16)
    acc = jnp.dot(h, w, preferred_element_type=jnp.float32)
    o_ref[...] = (acc + b_ref[...].astype(jnp.float32)).astype(o_ref.dtype)


def cat_last_net(H, W_t, b, *, tile_b=2048, use_bf16_matmul=False):
    """out = ReLU(H) @ W_t + b   (eval-mode CatLastNet forward).

    H:   [B, hidden]
    W_t: [hidden, cat_id_size]   (PyTorch Linear weight, pre-transposed)
    b:   [cat_id_size] or [1, cat_id_size]
    """
    B, Hd = H.shape
    C = W_t.shape[1]
    b = b.reshape(1, C)
    dtype = H.dtype
    itemsize = jnp.dtype(dtype).itemsize

    # ---- batch tile selection (no padding of H: grid uses cdiv, Pallas
    # masks the ragged last block). ----
    tb = _round_up(max(int(tile_b), 8), 8)
    # Never exceed the batch, and keep >= 2 grid steps so both v7x TCs work.
    tb = min(tb, _round_up(B, 8), max(8, _round_up(pl.cdiv(B, 2), 8)))

    # Single-buffer the grid-constant weight/bias once the weight is big
    # (matters on v7x: 64 MiB VMEM; a second copy of a large weight is waste).
    single_buffer_consts = _phys_bytes(Hd, C, itemsize) > (8 << 20)
    n_wbuf = 1 if single_buffer_consts else 2

    def _tile_footprint(tb_):
        return (2 * (_phys_bytes(tb_, Hd, itemsize) + _phys_bytes(tb_, C, itemsize))
                + n_wbuf * (_phys_bytes(Hd, C, itemsize) + _phys_bytes(1, C, itemsize)))

    # Shrink the batch tile until the double-buffered footprint fits a budget
    # that is safe on v7x (64 MiB physical VMEM per TensorCore).
    vmem_budget = 40 << 20
    while tb > 8 and _tile_footprint(tb) > vmem_budget:
        tb = max(8, _round_up(tb // 2, 8))

    grid = (pl.cdiv(B, tb),)

    # VMEM limit from the physical footprint + headroom for Mosaic internal
    # scratch; clamp well below physical VMEM (48 MiB, v7x-safe).
    vmem_bytes = int(min(max(_tile_footprint(tb) + (2 << 20), 4 << 20), 48 << 20))

    cost = pl.CostEstimate(
        flops=2 * B * Hd * C,
        transcendentals=0,
        bytes_accessed=(B * Hd + Hd * C + C + B * C) * itemsize,
    )

    const_kwargs = {"pipeline_mode": pl.Buffered(1)} if single_buffer_consts else {}

    # TODO(synk): for very large hidden/cat_id_size (weight >> VMEM) add K/N
    # grid axes with a VMEM accumulator (pl.when init/finalize); unnecessary
    # at sparsechem sizes.
    kernel = functools.partial(_cat_last_kernel, bf16_operands=use_bf16_matmul)

    out = pl.pallas_call(
        kernel,
        out_shape=jax.ShapeDtypeStruct((B, C), dtype),
        grid_spec=pltpu.PrefetchScalarGridSpec(
            num_scalar_prefetch=0,
            grid=grid,
            in_specs=[
                pl.BlockSpec((tb, Hd), lambda i: (i, 0)),               # batch-tiled H
                pl.BlockSpec((Hd, C), lambda i: (0, 0), **const_kwargs),  # resident W
                pl.BlockSpec((1, C), lambda i: (0, 0), **const_kwargs),   # resident bias
            ],
            out_specs=pl.BlockSpec((tb, C), lambda i: (i, 0)),
        ),
        compiler_params=pltpu.CompilerParams(
            dimension_semantics=("parallel",),
            vmem_limit_bytes=vmem_bytes,
        ),
        cost_estimate=cost,
    )(H, W_t, b)

    return out


def init_params(key, hidden_size, cat_id_size, dtype=jnp.float32):
    # xavier_uniform_ with gain = calculate_gain('sigmoid') = 1.0
    gain = 1.0
    fan_in, fan_out = hidden_size, cat_id_size
    limit = gain * (6.0 / (fan_in + fan_out)) ** 0.5
    # PyTorch Linear weight is [out, in]; we store its transpose [in, out].
    W_t = jax.random.uniform(
        key, (hidden_size, cat_id_size), dtype=dtype, minval=-limit, maxval=limit
    )
    b = jnp.full((1, cat_id_size), 0.1, dtype=dtype)
    return W_t, b


if __name__ == "__main__":
    hidden_size = 32       # conf.hidden_sizes[-1]
    cat_id_size = 16       # conf.cat_id_size

    key = jax.random.PRNGKey(0)
    k_h, k_w, k_h2 = jax.random.split(key, 3)
    W_t, b = init_params(k_w, hidden_size, cat_id_size)

    # Primary small-shape check (matches the toy module sizes).
    batch = 8
    H = jax.random.normal(k_h, (batch, hidden_size), dtype=jnp.float32)
    out = jax.block_until_ready(cat_last_net(H, W_t, b))
    ref = jnp.maximum(H, 0.0) @ W_t + b
    assert out.shape == (batch, cat_id_size)
    assert jnp.allclose(out, ref, atol=1e-5, rtol=1e-5)

    # Secondary check: multi-step grid with a ragged last batch tile
    # (40 = 2*16 + 8) -- exercises Pallas OOB masking, no wrapper pad/slice.
    batch2 = 40
    H2 = jax.random.normal(k_h2, (batch2, hidden_size), dtype=jnp.float32)
    out2 = jax.block_until_ready(cat_last_net(H2, W_t, b, tile_b=16))
    ref2 = jnp.maximum(H2, 0.0) @ W_t + b
    assert out2.shape == (batch2, cat_id_size)
    assert jnp.allclose(out2, ref2, atol=1e-5, rtol=1e-5)

    # Optional bf16-operand path (f32 accumulation) -- looser tolerance.
    out3 = jax.block_until_ready(cat_last_net(H2, W_t, b, use_bf16_matmul=True))
    assert out3.shape == (batch2, cat_id_size)
    assert jnp.allclose(out3, ref2, atol=5e-2, rtol=5e-2)

    print("KERNEL_OK")
</pallas_src>

<mosaic_0001>
module attributes {stable_mosaic.version = 11 : i64} {
  func.func @_cat_last_kernel(%arg0: i32, %arg1: memref<8x32xf32, #tpu.memory_space<vmem>>, %arg2: memref<32x16xf32, #tpu.memory_space<vmem>>, %arg3: memref<1x16xf32, #tpu.memory_space<vmem>>, %arg4: memref<8x16xf32, #tpu.memory_space<vmem>>) attributes {dimension_semantics = [#tpu.dimension_semantics<parallel>], iteration_bounds = array<i64: 1>, scalar_prefetch = 0 : i64, scratch_operands = 0 : i64, tpu.core_type = #tpu.core_type<tc>, window_params = [{transform_indices = @transform_0, window_bounds = array<i64: 8, 32>}, {pipeline_mode = #tpu.pipeline_mode<synchronous>, transform_indices = @transform_1, window_bounds = array<i64: 32, 16>}, {pipeline_mode = #tpu.pipeline_mode<synchronous>, transform_indices = @transform_2, window_bounds = array<i64: 1, 16>}, {transform_indices = @transform_3, window_bounds = array<i64: 8, 16>}]} {
    %c0 = arith.constant 0 : index
    %c0_0 = arith.constant 0 : index
    %0 = vector.load %arg1[%c0, %c0_0] : memref<8x32xf32, #tpu.memory_space<vmem>>, vector<8x32xf32>
    %cst = arith.constant 0.000000e+00 : f32
    %1 = vector.broadcast %cst : f32 to vector<8x32xf32>
    %2 = arith.maximumf %0, %1 : vector<8x32xf32>
    %c0_1 = arith.constant 0 : index
    %c0_2 = arith.constant 0 : index
    %3 = vector.load %arg2[%c0_1, %c0_2] : memref<32x16xf32, #tpu.memory_space<vmem>>, vector<32x16xf32>
    %cst_3 = arith.constant dense<0.000000e+00> : vector<8x16xf32>
    %4 = tpu.matmul %2, %3, %cst_3 {dimension_numbers = #tpu.dot_dimension_numbers<[1], [0], [0], [1], [0, 0, 1, 1], [], []>} : vector<8x32xf32>, vector<32x16xf32>, vector<8x16xf32> -> vector<8x16xf32>
    %c0_4 = arith.constant 0 : index
    %c0_5 = arith.constant 0 : index
    %5 = vector.load %arg3[%c0_4, %c0_5] : memref<1x16xf32, #tpu.memory_space<vmem>>, vector<1x16xf32>
    %6 = vector.broadcast %5 : vector<1x16xf32> to vector<8x16xf32>
    %7 = arith.addf %4, %6 : vector<8x16xf32>
    %c0_6 = arith.constant 0 : index
    %c0_7 = arith.constant 0 : index
    %8 = vector.load %arg4[%c0_6, %c0_7] : memref<8x16xf32, #tpu.memory_space<vmem>>, vector<8x16xf32>
    tpu.vector_store %arg4[%c0_6, %c0_7], %7 {strides = array<i32>} : memref<8x16xf32, #tpu.memory_space<vmem>>, vector<8x16xf32>,
    return
  }
  func.func @transform_0(%arg0: i32) -> (i32, i32) {
    %c0_i32 = arith.constant 0 : i32
    %c0_i32_0 = arith.constant 0 : i32
    return %arg0, %c0_i32 : i32, i32
  }
  func.func @transform_1(%arg0: i32) -> (i32, i32) {
    %c0_i32 = arith.constant 0 : i32
    %c0_i32_0 = arith.constant 0 : i32
    %c0_i32_1 = arith.constant 0 : i32
    return %c0_i32, %c0_i32_0 : i32, i32
  }
  func.func @transform_2(%arg0: i32) -> (i32, i32) {
    %c0_i32 = arith.constant 0 : i32
    %c0_i32_0 = arith.constant 0 : i32
    %c0_i32_1 = arith.constant 0 : i32
    return %c0_i32, %c0_i32_0 : i32, i32
  }
  func.func @transform_3(%arg0: i32) -> (i32, i32) {
    %c0_i32 = arith.constant 0 : i32
    %c0_i32_0 = arith.constant 0 : i32
    return %arg0, %c0_i32 : i32, i32
  }
}

</mosaic_0001>

<bundles_post_ra>
// kernel: tpu_custom_call.1
= control target key start
LH: loop header
LB: loop body
LE: loop exit
PB: predicated region body
PF: predicated region fallthrough
CT: control target
= control target key end

     0   :  { %s138_s0 = inlined_call_operand.vmem [shape: f32[8,32], index: 0, kind: input, shape index: {}]   ;;  %s139_s1 = inlined_call_operand.vmem [shape: f32[32,16], index: 1, kind: input, shape index: {}]   ;;  %s140_s2 = inlined_call_operand.vmem [shape: f32[1,16], index: 2, kind: input, shape index: {}]   ;;  %s141_s3 = inlined_call_operand.hbm [shape: f32[8,16], index: 3, kind: output, shape index: {}]  }
   0x1   :  { %v20_v0 = vld [vmem:[%s139_s1 + $0x18] sm:$0xff]  ;;  %v19_v1 = vld [vmem:[%s139_s1 + $0x10] sm:$0xff]  ;;  %v15_v2 = vld [vmem:[%s138_s0] sm:$0xff] }
   0x2   :  { %41 = vmatpush.msra.mxu0 %v20_v0  ;;  %v18_v3 = vld [vmem:[%s139_s1 + $0x8] sm:$0xff] }
   0x3   :  { %8 = vsyncpa [#allocation3], 0  ;;  %v17_v4 = vld [vmem:[%s139_s1] sm:$0xff]  ;;  %v16_v5 = vmax.f32 %v15_v2, 0.0  ;;  %vm25_vm0 = vcmask 261120   ;;  %s96_s0 = smov [#allocation2]  }
   0x4   :  { %42 = vmatpush.msra.mxu0 %v19_v1  ;;  %v69_v6 = vld [vmem:[%s140_s2] ss:$0 sm:$0xff]  ;;  %s56_s24 = sshll.u32 %s96_s0, 4  ;;  %s58_s27 = sshll.u32 %s141_s3, 4  ;;  %vm49_vm1 = vcmask 130048   ;;  %s57_s24 = int_to_ptr.vmem [resolvable:$true] %s56_s24  ;;  %s59_s27 = int_to_ptr.hbm [resolvable:$true] %s58_s27 }
   0x6   :  { %43 = vmatpush.msra.mxu0 %v18_v3 }
   0x8   :  { %44 = vmatpush.msra.mxu0 %v17_v4 }
   0x9   :  { %67 = vmatmul.msk.f32.vlgmr.msra.gmra.mxu0 %vm25_vm0, %v16_v5 }
  0x86   :  { %v46_v7 = vpop.f32.mrf.mxu0 }
  0x87   :  { %v47_v8 = vadd.f32 %v69_v6, %v46_v7 }
  0x89   :  { %50 = vst.msk [vmem:[#allocation2] sm:$0xff] %vm49_vm1, %v47_v8 }
  0x8a   :  { %61 = dma.vmem_to_hbm [thread:$0]  %s57_s24, 128, %s59_s27, [#allocation3]  }
  0x8b   :  { %94 = dma.done.wait [#allocation3], 128  }
  0x8c   :  { %95 = vsyncadd [#allocation3], 4294967168 }
  0x8d   :  { %66 = vsyncpa [#allocation3], 1 }

</bundles_post_ra>
